<compile_context>
chip_gen: v6e
topology: v6e:2x2x1
jax: 0.10.0
libtpu: 0.0.40
codegen_flags: <defaults>
</compile_context>

<pallas_src>
import jax
import jax.numpy as jnp
from jax.experimental import pallas as pl
from jax.experimental.pallas import tpu as pltpu

IN_F = 20    # l1 in_features
HID_F = 15   # l1 out_features / l2 in_features
OUT_F = 10   # l2 out_features
N_PAD = 128  # lane-dense padded width for hidden & output slabs


def mlp_kernel(x_ref, w1_ref, b1_ref, w2_ref, b2_ref, o_ref):
    # Layer 1: h = relu(x @ W1_pad + b1_pad)   (MXU matmul, f32 accumulate;
    # bias add + ReLU on the f32 accumulator -> VPU f32 path, v5e-friendly).
    x = x_ref[...]                                                     # [TB, 20]
    h = jnp.dot(x, w1_ref[...], preferred_element_type=jnp.float32)   # [TB, 128] f32
    h = jnp.maximum(h + b1_ref[...], 0.0)
    # Layer 2: y = h @ W2_pad + b2_pad. Cast h back to the weight dtype so the
    # MXU sees a matched (e.g. bf16 x bf16) op when bf16 inputs are used.
    y = jnp.dot(h.astype(w2_ref.dtype), w2_ref[...],
                preferred_element_type=jnp.float32)                   # [TB, 128] f32
    y = y + b2_ref[...]
    o_ref[...] = y.astype(o_ref.dtype)


def mymodel_forward(x, w1, b1, w2, b2, *, block_b=256,
                    compute_dtype=jnp.float32):
    """Forward pass of MyModel.

    x:  [B, 20] float32
    w1: [15, 20] (PyTorch nn.Linear layout), b1: [15]
    w2: [10, 15],                            b2: [10]
    Returns [B, 10] float32.
    """
    B = x.shape[0]

    # ---- lane-dense zero-padding of parameters (tiny, done once per call) ----
    w1_t = jnp.zeros((IN_F, N_PAD), jnp.float32).at[:, :HID_F].set(w1.T)
    b1_p = jnp.zeros((1, N_PAD), jnp.float32).at[:, :HID_F].set(b1)
    w2_t = jnp.zeros((N_PAD, N_PAD), jnp.float32).at[:HID_F, :OUT_F].set(w2.T)
    b2_p = jnp.zeros((1, N_PAD), jnp.float32).at[:, :OUT_F].set(b2)

    # bf16 option halves the streamed bytes of x (the binding resource);
    # biases stay f32 so elementwise work happens on the f32 accumulator.
    x = x.astype(compute_dtype)
    w1_t = w1_t.astype(compute_dtype)
    w2_t = w2_t.astype(compute_dtype)

    # ---- pad batch up to a multiple of the tile so every block is full ----
    grid_b = pl.cdiv(B, block_b)
    b_pad = grid_b * block_b
    if b_pad != B:
        x = jnp.pad(x, ((0, b_pad - B), (0, 0)))

    itemsize = jnp.dtype(compute_dtype).itemsize
    cost = pl.CostEstimate(
        flops=2 * b_pad * (IN_F * HID_F + HID_F * OUT_F),
        transcendentals=0,
        bytes_accessed=(b_pad * IN_F * itemsize            # x stream
                        + b_pad * N_PAD * 4                 # output slab
                        + (IN_F + N_PAD) * N_PAD * itemsize  # weights
                        + 2 * N_PAD * 4),                    # biases
    )

    out = pl.pallas_call(
        mlp_kernel,
        out_shape=jax.ShapeDtypeStruct((b_pad, N_PAD), jnp.float32),
        grid_spec=pltpu.PrefetchScalarGridSpec(
            num_scalar_prefetch=0,
            grid=(grid_b,),
            in_specs=[
                pl.BlockSpec((block_b, IN_F), lambda i: (i, 0)),   # x tile (pipelined)
                pl.BlockSpec((IN_F, N_PAD), lambda i: (0, 0)),     # W1 (VMEM-resident)
                pl.BlockSpec((1, N_PAD), lambda i: (0, 0)),        # b1
                pl.BlockSpec((N_PAD, N_PAD), lambda i: (0, 0)),    # W2
                pl.BlockSpec((1, N_PAD), lambda i: (0, 0)),        # b2
            ],
            out_specs=pl.BlockSpec((block_b, N_PAD), lambda i: (i, 0)),
        ),
        compiler_params=pltpu.CompilerParams(
            dimension_semantics=("parallel",),       # shards tiles across TCs on v7x
            vmem_limit_bytes=32 * 1024 * 1024,       # tiles are tiny; safe on v7x too
        ),
        cost_estimate=cost,
    )(x, w1_t, b1_p, w2_t, b2_p)

    # Slice away batch padding and the lane padding of the output slab.
    return out[:B, :OUT_F]


if __name__ == "__main__":
    # Deterministic parameters exactly as the PyTorch module sets them: all ones,
    # in PyTorch nn.Linear layout (weight is [out_features, in_features]).
    w1 = jnp.ones((HID_F, IN_F), dtype=jnp.float32)   # l1.weight
    b1 = jnp.ones((HID_F,), dtype=jnp.float32)        # l1.bias
    w2 = jnp.ones((OUT_F, HID_F), dtype=jnp.float32)  # l2.weight
    b2 = jnp.ones((OUT_F,), dtype=jnp.float32)        # l2.bias

    key = jax.random.PRNGKey(0)
    B = 1000                                          # exercises 4 batch tiles (TB=256)
    x = jax.random.normal(key, (B, IN_F), dtype=jnp.float32)

    # Pure-JAX reference.
    ref = jnp.maximum(x @ w1.T + b1, 0.0) @ w2.T + b2

    # f32 path: tight tolerance.
    out = jax.block_until_ready(mymodel_forward(x, w1, b1, w2, b2))
    assert out.shape == (B, OUT_F), out.shape
    assert jnp.allclose(out, ref, atol=1e-4, rtol=1e-4), "f32 mismatch vs reference"

    # bf16 streaming path (halves HBM bytes for x): looser tolerance.
    out_bf16 = jax.block_until_ready(
        mymodel_forward(x, w1, b1, w2, b2, compute_dtype=jnp.bfloat16))
    assert out_bf16.shape == (B, OUT_F), out_bf16.shape
    assert jnp.allclose(out_bf16, ref, atol=1.0, rtol=2e-2), "bf16 mismatch vs reference"

    print("KERNEL_OK")
</pallas_src>

<mosaic_0001>
module attributes {stable_mosaic.version = 11 : i64} {
  func.func @mlp_kernel(%arg0: i32, %arg1: memref<256x20xf32, #tpu.memory_space<vmem>>, %arg2: memref<20x128xf32, #tpu.memory_space<vmem>>, %arg3: memref<1x128xf32, #tpu.memory_space<vmem>>, %arg4: memref<128x128xf32, #tpu.memory_space<vmem>>, %arg5: memref<1x128xf32, #tpu.memory_space<vmem>>, %arg6: memref<256x128xf32, #tpu.memory_space<vmem>>) attributes {dimension_semantics = [#tpu.dimension_semantics<parallel>], iteration_bounds = array<i64: 4>, scalar_prefetch = 0 : i64, scratch_operands = 0 : i64, tpu.core_type = #tpu.core_type<tc>, window_params = [{transform_indices = @transform_0, window_bounds = array<i64: 256, 20>}, {pipeline_mode = #tpu.pipeline_mode<synchronous>, transform_indices = @transform_1, window_bounds = array<i64: 20, 128>}, {pipeline_mode = #tpu.pipeline_mode<synchronous>, transform_indices = @transform_2, window_bounds = array<i64: 1, 128>}, {pipeline_mode = #tpu.pipeline_mode<synchronous>, transform_indices = @transform_3, window_bounds = array<i64: 128, 128>}, {pipeline_mode = #tpu.pipeline_mode<synchronous>, transform_indices = @transform_4, window_bounds = array<i64: 1, 128>}, {transform_indices = @transform_5, window_bounds = array<i64: 256, 128>}]} {
    %c0 = arith.constant 0 : index
    %c0_0 = arith.constant 0 : index
    %0 = vector.load %arg1[%c0, %c0_0] : memref<256x20xf32, #tpu.memory_space<vmem>>, vector<256x20xf32>
    %c0_1 = arith.constant 0 : index
    %c0_2 = arith.constant 0 : index
    %1 = vector.load %arg2[%c0_1, %c0_2] : memref<20x128xf32, #tpu.memory_space<vmem>>, vector<20x128xf32>
    %cst = arith.constant dense<0.000000e+00> : vector<256x128xf32>
    %2 = tpu.matmul %0, %1, %cst {dimension_numbers = #tpu.dot_dimension_numbers<[1], [0], [0], [1], [0, 0, 1, 1], [], []>} : vector<256x20xf32>, vector<20x128xf32>, vector<256x128xf32> -> vector<256x128xf32>
    %c0_3 = arith.constant 0 : index
    %c0_4 = arith.constant 0 : index
    %3 = vector.load %arg3[%c0_3, %c0_4] : memref<1x128xf32, #tpu.memory_space<vmem>>, vector<1x128xf32>
    %4 = vector.broadcast %3 : vector<1x128xf32> to vector<256x128xf32>
    %5 = arith.addf %2, %4 : vector<256x128xf32>
    %cst_5 = arith.constant 0.000000e+00 : f32
    %6 = vector.broadcast %cst_5 : f32 to vector<256x128xf32>
    %7 = arith.maximumf %5, %6 : vector<256x128xf32>
    %c0_6 = arith.constant 0 : index
    %c0_7 = arith.constant 0 : index
    %8 = vector.load %arg4[%c0_6, %c0_7] : memref<128x128xf32, #tpu.memory_space<vmem>>, vector<128x128xf32>
    %cst_8 = arith.constant dense<0.000000e+00> : vector<256x128xf32>
    %9 = tpu.matmul %7, %8, %cst_8 {dimension_numbers = #tpu.dot_dimension_numbers<[1], [0], [0], [1], [0, 0, 1, 1], [], []>} : vector<256x128xf32>, vector<128x128xf32>, vector<256x128xf32> -> vector<256x128xf32>
    %c0_9 = arith.constant 0 : index
    %c0_10 = arith.constant 0 : index
    %10 = vector.load %arg5[%c0_9, %c0_10] : memref<1x128xf32, #tpu.memory_space<vmem>>, vector<1x128xf32>
    %11 = vector.broadcast %10 : vector<1x128xf32> to vector<256x128xf32>
    %12 = arith.addf %9, %11 : vector<256x128xf32>
    %c0_11 = arith.constant 0 : index
    %c0_12 = arith.constant 0 : index
    %13 = vector.load %arg6[%c0_11, %c0_12] : memref<256x128xf32, #tpu.memory_space<vmem>>, vector<256x128xf32>
    tpu.vector_store %arg6[%c0_11, %c0_12], %12 {strides = array<i32>} : memref<256x128xf32, #tpu.memory_space<vmem>>, vector<256x128xf32>,
    return
  }
  func.func @transform_0(%arg0: i32) -> (i32, i32) {
    %c0_i32 = arith.constant 0 : i32
    %c0_i32_0 = arith.constant 0 : i32
    return %arg0, %c0_i32 : i32, i32
  }
  func.func @transform_1(%arg0: i32) -> (i32, i32) {
    %c0_i32 = arith.constant 0 : i32
    %c0_i32_0 = arith.constant 0 : i32
    %c0_i32_1 = arith.constant 0 : i32
    return %c0_i32, %c0_i32_0 : i32, i32
  }
  func.func @transform_2(%arg0: i32) -> (i32, i32) {
    %c0_i32 = arith.constant 0 : i32
    %c0_i32_0 = arith.constant 0 : i32
    %c0_i32_1 = arith.constant 0 : i32
    return %c0_i32, %c0_i32_0 : i32, i32
  }
  func.func @transform_3(%arg0: i32) -> (i32, i32) {
    %c0_i32 = arith.constant 0 : i32
    %c0_i32_0 = arith.constant 0 : i32
    %c0_i32_1 = arith.constant 0 : i32
    return %c0_i32, %c0_i32_0 : i32, i32
  }
  func.func @transform_4(%arg0: i32) -> (i32, i32) {
    %c0_i32 = arith.constant 0 : i32
    %c0_i32_0 = arith.constant 0 : i32
    %c0_i32_1 = arith.constant 0 : i32
    return %c0_i32, %c0_i32_0 : i32, i32
  }
  func.func @transform_5(%arg0: i32) -> (i32, i32) {
    %c0_i32 = arith.constant 0 : i32
    %c0_i32_0 = arith.constant 0 : i32
    return %arg0, %c0_i32 : i32, i32
  }
}

</mosaic_0001>

<bundles_post_ra>
// kernel: tpu_custom_call.1
= control target key start
LH: loop header
LB: loop body
LE: loop exit
PB: predicated region body
PF: predicated region fallthrough
CT: control target
= control target key end

     0   :  { %10 = vsyncpa [#allocation3], 0  ;;  %s1752_s0 = inlined_call_operand.vmem [shape: f32[1024,20], index: 0, kind: input, shape index: {}]   ;;  %s1753_s1 = inlined_call_operand.vmem [shape: f32[20,128], index: 1, kind: input, shape index: {}]   ;;  %s1754_s2 = inlined_call_operand.vmem [shape: f32[1,128], index: 2, kind: input, shape index: {}]   ;;  %s1755_s3 = inlined_call_operand.vmem [shape: f32[128,128], index: 3, kind: input, shape index: {}]   ;;  %s1756_s4 = inlined_call_operand.vmem [shape: f32[1,128], index: 4, kind: input, shape index: {}]   ;;  %s1757_s5 = inlined_call_operand.hbm [shape: f32[1024,128], index: 5, kind: output, shape index: {}]  }
   0x1   :  { %12 = vsyncpa [#allocation3 + $0x1], 0  ;;  %s1415_s18 = smov 0   ;;  %s1417_s19 = smov 0  }
   0x2   :  { %s1419_s20 = smov 0   ;;  %s1421_s21 = smov 0  }
   0x3 LB: > { %s1436_s22 = sadd.s32 4294967295, %s1380_s21   ;;  %s982_s23 = sadd.s32 4294967294, %s1380_s21   ;;  %s1380_s21 = sphi %s1421_s21, %s1763_s21   ;;  %s1376_s20 = sphi %s1419_s20, %s1762_s20   ;;  %s1372_s19 = sphi %s1417_s19, %s1761_s19   ;;  %s1368_s18 = sphi %s1415_s18, %s1760_s18  }
   0x4   : > { %s1440_s24 = sadd.s32 1, %s1380_s21   ;;  %s135_s25 = sadd.s32 1, %s1376_s20 }
   0x5   : > { %s132_s26 = ssub.s32 %s1380_s21, %s1440_s24  ;;  %p145_p0 = scmp.ne.s32.totalorder %s1376_s20, %s1372_s19 }
   0x6   : > { %p133_p1 = scmp.eq.s32.totalorder %s132_s26, 0  ;;  %p146_p2 = scmp.eq.s32.totalorder %s1436_s22, 3 }
   0x7   : > { %p151_p3 = scmp.ne.s32.totalorder %s1372_s19, %s1368_s18  ;;  %p152_p4 = scmp.eq.s32.totalorder %s982_s23, 3 }
   0x8   : > { %s1451_s27 = scalar_select %p133_p1, %s1376_s20, %s135_s25  }
   0x9   : > { %p1453_p5 = por %p146_p2, %p145_p0  ;;  %p1457_p6 = por %p152_p4, %p151_p3 }
   0xa   : > { %p985_p7 = scmp.ge.s32.totalorder %s1380_s21, 1  ;;  %p191_p8 = scmp.lt.s32.totalorder %s1380_s21, 5 }
   0xc   : > { %p192_p9 = pnand %p985_p7, %p191_p8 }
   0xd   : > { %s987_s9 = sshll.u32 (!%p192_p9), %s1436_s22, 5  ;;  %s216_s23 = sand.u32 (!%p192_p9), 1, %s1372_s19  }
   0xe   : > { %195 = sbr.rel (%p192_p9) target bundleno = 499 (0x1f3), region = 40  ;;  %p220_p10 = scmp.lt.s32.totalorder (!%p192_p9), %s987_s9, 127 }
   0xf   : > { %s986_s25 = sshll.u32 (!%p192_p9), %s216_s23, 8  ;;  %s1029_s8 = sshll.u32 (!%p192_p9), %s1436_s22, 12 }
  0x10   : > { %s1636_s7 = scalar_lea.vmem (!%p192_p9), [#allocation2], %s986_s25  ;;  %s1703_s12 = scalar_lea.hbm (!%p192_p9), %s1757_s5, %s1029_s8 }
  0x11   : > { %s1712_s22 = scalar_lea.sflag (!%p192_p9), [#allocation3], %s216_s23  ;;  %s1382_s14 = smov (!%p192_p9), [#allocation2]  }
  0x13   : > { %v260_v0 = vld [vmem:[%s1753_s1 + $0x10] sm:$0xf]  ;;  %vm365_vm0 = vcmask 1043456   ;;  %v259_v1 = vld [vmem:[%s1753_s1 + $0x8] sm:$0xff]  ;;  %v641_v2 = vld [vmem:[%s1755_s3 + $0x78] sm:$0xff]  ;;  %s1765_s9 = smov (!%p220_p10, %s987_s9), 127 }
  0x14   : > { %1113 = vmatprep.subr.msk.mxu0 %vm365_vm0, %v260_v0  ;;  %v258_v3 = vld [vmem:[%s1753_s1] sm:$0xff]  ;;  %1247 = vmatprep.subr.mxu1 %v641_v2  ;;  %v640_v4 = vld [vmem:[%s1755_s3 + $0x70] sm:$0xff]  ;;  %s988_s16 = sshll.u32 %s1765_s9, 3  ;;  %vm268_vm1 = vcmask 162816   ;;  %v639_v5 = vld [vmem:[%s1755_s3 + $0x68] sm:$0xff]  ;;  %s920_s9 = sshll.u32 %s1636_s7, 4  ;;  %s1705_s9 = int_to_ptr.vmem [resolvable:$true] %s920_s9 }
  0x15   : > { %1114 = vmatpush3.msk.msra.mxu0 %vm365_vm0, %v260_v0  ;;  %1263 = vmatpush3.msra.mxu1 %v641_v2  ;;  %s1485_s30 = scalar_lea.vmem %s1752_s0, %s988_s16  ;;  %v638_v6 = vld [vmem:[%s1755_s3 + $0x60] sm:$0xff]  ;;  %v637_v11 = vld [vmem:[%s1755_s3 + $0x58] sm:$0xff]  ;;  %v636_v14 = vld [vmem:[%s1755_s3 + $0x50] sm:$0xff]  ;;  %s1320_s13 = scalar_lea.vmem %s1705_s9, 4096 }
  0x16   : > { %1115 = vmatprep.subr.mxu0 %v259_v1  ;;  %1248 = vmatprep.subr.mxu1 %v640_v4  ;;  %v226_v7 = vld [vmem:[%s1485_s30] sm:$0xff]  ;;  %v227_v8 = vld [vmem:[%s1485_s30 + $0x8] sm:$0xff]  ;;  %v228_v9 = vld [vmem:[%s1485_s30 + $0x10] sm:$0xff]  ;;  %p1321_p11 = scmp.ne.s32.totalorder %s1705_s9, %s1320_s13 }
  0x17   : > { %1116 = vmatpush3.msra.mxu0 %v259_v1  ;;  %1264 = vmatpush3.msra.mxu1 %v640_v4  ;;  %v229_v10 = vld [vmem:[%s1485_s30 + $0x18] sm:$0xff]  ;;  %v230_v12 = vld [vmem:[%s1485_s30 + $0x20] sm:$0xff]  ;;  %v231_v13 = vld [vmem:[%s1485_s30 + $0x28] sm:$0xff] }
  0x18   : > { %1117 = vmatprep.subr.mxu0 %v258_v3  ;;  %1249 = vmatprep.subr.mxu1 %v639_v5  ;;  %v232_v15 = vld [vmem:[%s1485_s30 + $0x30] sm:$0xff]  ;;  %v233_v16 = vld [vmem:[%s1485_s30 + $0x38] sm:$0xff]  ;;  %v635_v17 = vld [vmem:[%s1755_s3 + $0x48] sm:$0xff]  ;;  %p1322_p12 = pnand %p1321_p11, %p1453_p5 }
  0x19   : > { %1118 = vmatpush3.msra.mxu0 %v258_v3  ;;  %1265 = vmatpush3.msra.mxu1 %v639_v5  ;;  %v234_v18 = vld [vmem:[%s1485_s30 + $0x40] sm:$0xff]  ;;  %v235_v20 = vld [vmem:[%s1485_s30 + $0x48] sm:$0xff]  ;;  %v633_v21 = vld [vmem:[%s1755_s3 + $0x38] sm:$0xff] }
  0x1a   : > { %1167 = vmatprep.subr.mxu0 %v641_v2  ;;  %1119 = vmatprep.mubr.msk.f32.mxu0 %vm268_vm1, %v226_v7  ;;  %v634_v19 = vld [vmem:[%s1755_s3 + $0x40] sm:$0xff]  ;;  %v236_v22 = vld [vmem:[%s1485_s30 + $0x50] sm:$0xff]  ;;  %v237_v24 = vld [vmem:[%s1485_s30 + $0x58] sm:$0xff]  ;;  %p1323_p13 = pneg %p1322_p12 }
  0x1b   : > { %1250 = vmatprep.subr.mxu1 %v638_v6  ;;  %1120 = vmatmul.mubr.msk.f32.vlgmr.msra.gmra.mxu0 %vm268_vm1, %v227_v8  ;;  %v632_v23 = vld [vmem:[%s1755_s3 + $0x30] sm:$0xff]  ;;  %v631_v25 = vld [vmem:[%s1755_s3 + $0x28] sm:$0xff]  ;;  %v238_v26 = vld [vmem:[%s1485_s30 + $0x60] sm:$0xff] }
  0x1c   : > { %1266 = vmatpush3.msra.mxu1 %v638_v6  ;;  %1122 = vmatprep.mubr.msk.f32.mxu0 %vm268_vm1, %v228_v9  ;;  %v630_v27 = vld [vmem:[%s1755_s3 + $0x20] sm:$0xff]  ;;  %v239_v28 = vld [vmem:[%s1485_s30 + $0x68] sm:$0xff]  ;;  %v240_v29 = vld [vmem:[%s1485_s30 + $0x70] sm:$0xff] }
  0x1d   : > { %1168 = vmatpush3.msra.mxu0 %v641_v2  ;;  %1251 = vmatprep.subr.mxu1 %v637_v11  ;;  %v241_v30 = vld [vmem:[%s1485_s30 + $0x78] sm:$0xff]  ;;  %v242_v31 = vld [vmem:[%s1485_s30 + $0x80] sm:$0xff]  ;;  %v243_v32 = vld [vmem:[%s1485_s30 + $0x88] sm:$0xff] }
  0x1e   : > { %1169 = vmatprep.subr.mxu0 %v640_v4  ;;  %1267 = vmatpush3.msra.mxu1 %v637_v11  ;;  %v244_v33 = vld [vmem:[%s1485_s30 + $0x90] sm:$0xff]  ;;  %v245_v34 = vld [vmem:[%s1485_s30 + $0x98] sm:$0xff]  ;;  %v246_v35 = vld [vmem:[%s1485_s30 + $0xa0] sm:$0xff] }
  0x1f   : > { %1170 = vmatpush3.msra.mxu0 %v640_v4  ;;  %1252 = vmatprep.subr.mxu1 %v636_v14  ;;  %v247_v36 = vld [vmem:[%s1485_s30 + $0xa8] sm:$0xff]  ;;  %v248_v37 = vld [vmem:[%s1485_s30 + $0xb0] sm:$0xff]  ;;  %v249_v38 = vld [vmem:[%s1485_s30 + $0xb8] sm:$0xff] }
  0x20   : > { %1123 = vmatmul.mubr.msk.f32.gmra.mxu0 %vm268_vm1, %v229_v10  ;;  %1171 = vmatprep.subr.mxu0 %v639_v5  ;;  %v250_v39 = vld [vmem:[%s1485_s30 + $0xc0] sm:$0xff]  ;;  %v251_v40 = vld [vmem:[%s1485_s30 + $0xc8] sm:$0xff]  ;;  %v252_v41 = vld [vmem:[%s1485_s30 + $0xd0] sm:$0xff] }
  0x21   : > { %1125 = vmatprep.mubr.msk.f32.mxu0 %vm268_vm1, %v230_v12  ;;  %1172 = vmatpush3.msra.mxu0 %v639_v5  ;;  %v253_v42 = vld [vmem:[%s1485_s30 + $0xd8] sm:$0xff]  ;;  %v254_v43 = vld [vmem:[%s1485_s30 + $0xe0] sm:$0xff]  ;;  %v255_v44 = vld [vmem:[%s1485_s30 + $0xe8] sm:$0xff] }
  0x22   : > { %1173 = vmatprep.subr.mxu0 %v638_v6  ;;  %1268 = vmatpush3.msra.mxu1 %v636_v14  ;;  %v256_v45 = vld [vmem:[%s1485_s30 + $0xf0] sm:$0xff]  ;;  %v257_v46 = vld [vmem:[%s1485_s30 + $0xf8] sm:$0xff]  ;;  %v627_v49 = vld [vmem:[%s1755_s3 + $0x8] sm:$0xff]  ;;  %s1324_s30 = sshll.u32 %s1382_s14, 4  ;;  %s1325_s30 = int_to_ptr.vmem [resolvable:$false] %s1324_s30 }
  0x23   : > { %1174 = vmatpush3.msra.mxu0 %v638_v6  ;;  %1253 = vmatprep.subr.mxu1 %v635_v17  ;;  %v629_v47 = vld [vmem:[%s1755_s3 + $0x18] sm:$0xff]  ;;  %v628_v48 = vld [vmem:[%s1755_s3 + $0x10] sm:$0xff]  ;;  %v626_v50 = vld [vmem:[%s1755_s3] sm:$0xff]  ;;  %s1326_s15 = scalar_lea.vmem %s1325_s30, 8192  ;;  %p1327_p0 = scmp.lt.s32.totalorder %s1705_s9, %s1325_s30 }
  0x24   : > { %1126 = vmatmul.mubr.msk.f32.gmra.mxu0 %vm268_vm1, %v231_v13  ;;  %1175 = vmatprep.subr.mxu0 %v637_v11  ;;  %v1593_v51 = vld [vmem:[%s1754_s2] ss:$0 sm:$0xff]  ;;  %p1328_p1 = scmp.lt.s32.totalorder %s1326_s15, %s1320_s13 }
  0x25   : > { %1128 = vmatprep.mubr.msk.f32.mxu0 %vm268_vm1, %v232_v15  ;;  %1176 = vmatpush3.msra.mxu0 %v637_v11 }
  0x26   : > { %1177 = vmatprep.subr.mxu0 %v636_v14  ;;  %1269 = vmatpush3.msra.mxu1 %v635_v17  ;;  %p1329_p2 = por %p1328_p1, %p1327_p0 }
  0x27   : > { %1178 = vmatpush3.msra.mxu0 %v636_v14  ;;  %1254 = vmatprep.subr.mxu1 %v634_v19 }
  0x28   : > { %1129 = vmatmul.mubr.msk.f32.gmra.mxu0 %vm268_vm1, %v233_v16  ;;  %1179 = vmatprep.subr.mxu0 %v635_v17  ;;  %p1330_p3 = pnand %p1329_p2, %p1323_p13 }
  0x29   : > { %1131 = vmatprep.mubr.msk.f32.mxu0 %vm268_vm1, %v234_v18  ;;  %1180 = vmatpush3.msra.mxu0 %v635_v17 }
  0x2a   : > { %1181 = vmatprep.subr.mxu0 %v634_v19  ;;  %1270 = vmatpush3.msra.mxu1 %v634_v19 }
  0x2b   : > { %1182 = vmatpush3.msra.mxu0 %v634_v19  ;;  %1255 = vmatprep.subr.mxu1 %v633_v21 }
  0x2c   : > { %1132 = vmatmul.mubr.msk.f32.gmra.mxu0 %vm268_vm1, %v235_v20  ;;  %1183 = vmatprep.subr.mxu0 %v633_v21 }
  0x2d   : > { %1134 = vmatprep.mubr.msk.f32.mxu0 %vm268_vm1, %v236_v22  ;;  %1184 = vmatpush3.msra.mxu0 %v633_v21 }
  0x2e   : > { %1185 = vmatprep.subr.mxu0 %v632_v23  ;;  %1271 = vmatpush3.msra.mxu1 %v633_v21 }
  0x2f   : > { %1186 = vmatpush3.msra.mxu0 %v632_v23  ;;  %1256 = vmatprep.subr.mxu1 %v632_v23 }
  0x30   : > { %1135 = vmatmul.mubr.msk.f32.gmra.mxu0 %vm268_vm1, %v237_v24  ;;  %1187 = vmatprep.subr.mxu0 %v631_v25 }
  0x31   : > { %1137 = vmatprep.mubr.msk.f32.mxu0 %vm268_vm1, %v238_v26  ;;  %1188 = vmatpush3.msra.mxu0 %v631_v25 }
  0x32   : > { %1189 = vmatprep.subr.mxu0 %v630_v27  ;;  %1272 = vmatpush3.msra.mxu1 %v632_v23 }
  0x33   : > { %1190 = vmatpush3.msra.mxu0 %v630_v27  ;;  %1257 = vmatprep.subr.mxu1 %v631_v25 }
  0x34   : > { %1138 = vmatmul.mubr.msk.f32.gmra.mxu0 %vm268_vm1, %v239_v28  ;;  %1273 = vmatpush3.msra.mxu1 %v631_v25 }
  0x35   : > { %1140 = vmatprep.mubr.msk.f32.mxu0 %vm268_vm1, %v240_v29  ;;  %1258 = vmatprep.subr.mxu1 %v630_v27 }
  0x36   : > { %1274 = vmatpush3.msra.mxu1 %v630_v27  ;;  %1191 = vmatprep.subr.mxu0 %v629_v47 }
  0x37   : > { %1259 = vmatprep.subr.mxu1 %v629_v47  ;;  %1192 = vmatpush3.msra.mxu0 %v629_v47 }
  0x38   : > { %1141 = vmatmul.mubr.msk.f32.gmra.mxu0 %vm268_vm1, %v241_v30  ;;  %1275 = vmatpush3.msra.mxu1 %v629_v47 }
  0x39   : > { %1143 = vmatprep.mubr.msk.f32.mxu0 %vm268_vm1, %v242_v31  ;;  %1193 = vmatprep.subr.mxu0 %v628_v48 }
  0x3a   : > { %1260 = vmatprep.subr.mxu1 %v628_v48  ;;  %1194 = vmatpush3.msra.mxu0 %v628_v48 }
  0x3b   : > { %1276 = vmatpush3.msra.mxu1 %v628_v48  ;;  %1195 = vmatprep.subr.mxu0 %v627_v49 }
  0x3c   : > { %1144 = vmatmul.mubr.msk.f32.gmra.mxu0 %vm268_vm1, %v243_v32  ;;  %1261 = vmatprep.subr.mxu1 %v627_v49 }
  0x3d   : > { %1146 = vmatprep.mubr.msk.f32.mxu0 %vm268_vm1, %v244_v33  ;;  %1196 = vmatpush3.msra.mxu0 %v627_v49 }
  0x3e   : > { %1277 = vmatpush3.msra.mxu1 %v627_v49  ;;  %1197 = vmatprep.subr.mxu0 %v626_v50 }
  0x3f   : > { %1262 = vmatprep.subr.mxu1 %v626_v50  ;;  %1198 = vmatpush3.msra.mxu0 %v626_v50 }
  0x40   : > { %1147 = vmatmul.mubr.msk.f32.gmra.mxu0 %vm268_vm1, %v245_v34  ;;  %1278 = vmatpush3.msra.mxu1 %v626_v50 }
  0x41   : > { %1149 = vmatprep.mubr.msk.f32.mxu0 %vm268_vm1, %v246_v35 }
  0x44   : > { %1150 = vmatmul.mubr.msk.f32.gmra.mxu0 %vm268_vm1, %v247_v36 }
  0x45   : > { %1152 = vmatprep.mubr.msk.f32.mxu0 %vm268_vm1, %v248_v37 }
  0x48   : > { %1153 = vmatmul.mubr.msk.f32.gmra.mxu0 %vm268_vm1, %v249_v38 }
  0x49   : > { %1155 = vmatprep.mubr.msk.f32.mxu0 %vm268_vm1, %v250_v39 }
  0x4c   : > { %1156 = vmatmul.mubr.msk.f32.gmra.mxu0 %vm268_vm1, %v251_v40 }
  0x4d   : > { %1158 = vmatprep.mubr.msk.f32.mxu0 %vm268_vm1, %v252_v41 }
  0x50   : > { %1159 = vmatmul.mubr.msk.f32.gmra.mxu0 %vm268_vm1, %v253_v42 }
  0x51   : > { %1161 = vmatprep.mubr.msk.f32.mxu0 %vm268_vm1, %v254_v43 }
  0x54   : > { %1162 = vmatmul.mubr.msk.f32.gmra.mxu0 %vm268_vm1, %v255_v44 }
  0x55   : > { %1164 = vmatprep.mubr.msk.f32.mxu0 %vm268_vm1, %v256_v45 }
  0x58   : > { %1165 = vmatmul.mubr.msk.f32.gmra.mxu0 %vm268_vm1, %v257_v46 }
  0xdb   : > { %v1121_v52 = vpop.f32.mrf.mxu0 }
  0xdc   : > { %v441_v53 = vadd.f32 %v1121_v52, %v1593_v51 }
  0xdd   : > { %v435_v54 = vpop.f32.mrf.mxu0 }
  0xde   : > { %v436_v55 = vadd.f32 %v1593_v51, %v435_v54  ;;  %v595_v58 = vmax.f32 %v441_v53, 0.0 }
  0xe0   : > { %v1124_v56 = vpop.f32.mrf.mxu0  ;;  %v594_v57 = vmax.f32 %v436_v55, 0.0 }
  0xe1   : > { %v451_v59 = vadd.f32 %v1124_v56, %v1593_v51 }
  0xe2   : > { %v445_v60 = vpop.f32.mrf.mxu0  ;;  %1199 = vmatprep.mubr.f32.mxu0 %v594_v57 }
  0xe3   : > { %v446_v61 = vadd.f32 %v1593_v51, %v445_v60  ;;  %1200 = vmatmul.mubr.f32.vlgmr.msra.gmra.mxu0 %v595_v58  ;;  %v597_v0 = vmax.f32 %v451_v59, 0.0 }
  0xe4   : > { %v1127_v62 = vpop.f32.mrf.mxu0 }
  0xe5   : > { %v596_v63 = vmax.f32 %v446_v61, 0.0  ;;  %v461_v1 = vadd.f32 %v1127_v62, %v1593_v51 }
  0xe6   : > { %v455_v2 = vpop.f32.mrf.mxu0 }
  0xe7   : > { %v456_v3 = vadd.f32 %v1593_v51, %v455_v2  ;;  %1202 = vmatprep.mubr.f32.mxu0 %v596_v63  ;;  %v599_v6 = vmax.f32 %v461_v1, 0.0 }
  0xe8   : > { %v1130_v4 = vpop.f32.mrf.mxu0  ;;  %1203 = vmatmul.mubr.f32.gmra.mxu0 %v597_v0 }
  0xe9   : > { %v598_v5 = vmax.f32 %v456_v3, 0.0  ;;  %v471_v7 = vadd.f32 %v1130_v4, %v1593_v51 }
  0xea   : > { %v465_v8 = vpop.f32.mrf.mxu0 }
  0xeb   : > { %1205 = vmatprep.mubr.f32.mxu0 %v598_v5  ;;  %v466_v9 = vadd.f32 %v1593_v51, %v465_v8  ;;  %v601_v12 = vmax.f32 %v471_v7, 0.0 }
  0xec   : > { %v1133_v10 = vpop.f32.mrf.mxu0  ;;  %1206 = vmatmul.mubr.f32.gmra.mxu0 %v599_v6 }
  0xed   : > { %v600_v11 = vmax.f32 %v466_v9, 0.0  ;;  %v481_v13 = vadd.f32 %v1133_v10, %v1593_v51 }
  0xee   : > { %v475_v14 = vpop.f32.mrf.mxu0 }
  0xef   : > { %v476_v15 = vadd.f32 %v1593_v51, %v475_v14  ;;  %1208 = vmatprep.mubr.f32.mxu1 %v600_v11  ;;  %v603_v18 = vmax.f32 %v481_v13, 0.0 }
  0xf0   : > { %v1136_v16 = vpop.f32.mrf.mxu0  ;;  %1209 = vmatmul.mubr.f32.vlgmr.msra.gmra.mxu1 %v601_v12 }
  0xf1   : > { %v602_v17 = vmax.f32 %v476_v15, 0.0  ;;  %v491_v19 = vadd.f32 %v1136_v16, %v1593_v51 }
  0xf2   : > { %v485_v20 = vpop.f32.mrf.mxu0 }
  0xf3   : > { %v486_v21 = vadd.f32 %v1593_v51, %v485_v20  ;;  %1211 = vmatprep.mubr.f32.mxu1 %v602_v17  ;;  %v605_v24 = vmax.f32 %v491_v19, 0.0 }
  0xf4   : > { %v1139_v22 = vpop.f32.mrf.mxu0  ;;  %1212 = vmatmul.mubr.f32.gmra.mxu1 %v603_v18 }
  0xf5   : > { %v604_v23 = vmax.f32 %v486_v21, 0.0  ;;  %v501_v25 = vadd.f32 %v1139_v22, %v1593_v51  ;;  %v1633_v21 = vld [vmem:[%s1756_s4] ss:$0 sm:$0xff] }
  0xf6   : > { %v495_v26 = vpop.f32.mrf.mxu0 }
  0xf7   : > { %v496_v27 = vadd.f32 %v1593_v51, %v495_v26  ;;  %1214 = vmatprep.mubr.f32.mxu1 %v604_v23  ;;  %v607_v30 = vmax.f32 %v501_v25, 0.0 }
  0xf8   : > { %v1142_v28 = vpop.f32.mrf.mxu0  ;;  %1215 = vmatmul.mubr.f32.gmra.mxu1 %v605_v24 }
  0xf9   : > { %v606_v29 = vmax.f32 %v496_v27, 0.0  ;;  %v511_v31 = vadd.f32 %v1142_v28, %v1593_v51 }
  0xfa   : > { %v505_v32 = vpop.f32.mrf.mxu0 }
  0xfb   : > { %v506_v33 = vadd.f32 %v1593_v51, %v505_v32  ;;  %1217 = vmatprep.mubr.f32.mxu1 %v606_v29  ;;  %v609_v36 = vmax.f32 %v511_v31, 0.0 }
  0xfc   : > { %v1145_v34 = vpop.f32.mrf.mxu0  ;;  %1218 = vmatmul.mubr.f32.gmra.mxu1 %v607_v30 }
  0xfd   : > { %v608_v35 = vmax.f32 %v506_v33, 0.0  ;;  %v521_v37 = vadd.f32 %v1145_v34, %v1593_v51 }
  0xfe   : > { %v515_v38 = vpop.f32.mrf.mxu0 }
  0xff   : > { %v516_v39 = vadd.f32 %v1593_v51, %v515_v38  ;;  %1220 = vmatprep.mubr.f32.mxu1 %v608_v35  ;;  %v611_v42 = vmax.f32 %v521_v37, 0.0 }
 0x100   : > { %v1148_v40 = vpop.f32.mrf.mxu0  ;;  %1221 = vmatmul.mubr.f32.gmra.mxu1 %v609_v36 }
 0x101   : > { %v610_v41 = vmax.f32 %v516_v39, 0.0  ;;  %v531_v43 = vadd.f32 %v1148_v40, %v1593_v51 }
 0x102   : > { %v525_v44 = vpop.f32.mrf.mxu0 }
 0x103   : > { %v526_v45 = vadd.f32 %v1593_v51, %v525_v44  ;;  %1223 = vmatprep.mubr.f32.mxu1 %v610_v41  ;;  %v613_v48 = vmax.f32 %v531_v43, 0.0 }
 0x104   : > { %v1151_v46 = vpop.f32.mrf.mxu0  ;;  %1224 = vmatmul.mubr.f32.gmra.mxu1 %v611_v42 }
 0x105   : > { %v612_v47 = vmax.f32 %v526_v45, 0.0  ;;  %v541_v49 = vadd.f32 %v1151_v46, %v1593_v51 }
 0x106   : > { %v535_v50 = vpop.f32.mrf.mxu0 }
 0x107   : > { %v536_v52 = vadd.f32 %v1593_v51, %v535_v50  ;;  %1226 = vmatprep.mubr.f32.mxu1 %v612_v47  ;;  %v615_v55 = vmax.f32 %v541_v49, 0.0 }
 0x108   : > { %v1154_v53 = vpop.f32.mrf.mxu0  ;;  %1227 = vmatmul.mubr.f32.gmra.mxu1 %v613_v48 }
 0x109   : > { %v614_v54 = vmax.f32 %v536_v52, 0.0  ;;  %v551_v56 = vadd.f32 %v1154_v53, %v1593_v51 }
 0x10a   : > { %v545_v57 = vpop.f32.mrf.mxu0 }
 0x10b   : > { %v546_v58 = vadd.f32 %v1593_v51, %v545_v57  ;;  %1229 = vmatprep.mubr.f32.mxu1 %v614_v54  ;;  %v617_v61 = vmax.f32 %v551_v56, 0.0 }
 0x10c   : > { %v1157_v59 = vpop.f32.mrf.mxu0  ;;  %1230 = vmatmul.mubr.f32.gmra.mxu1 %v615_v55 }
 0x10d   : > { %v616_v60 = vmax.f32 %v546_v58, 0.0  ;;  %v561_v62 = vadd.f32 %v1157_v59, %v1593_v51 }
 0x10e   : > { %v555_v63 = vpop.f32.mrf.mxu0 }
 0x10f   : > { %v556_v0 = vadd.f32 %v1593_v51, %v555_v63  ;;  %1232 = vmatprep.mubr.f32.mxu1 %v616_v60  ;;  %v619_v3 = vmax.f32 %v561_v62, 0.0 }
 0x110   : > { %v1160_v1 = vpop.f32.mrf.mxu0  ;;  %1233 = vmatmul.mubr.f32.gmra.mxu1 %v617_v61 }
 0x111   : > { %v618_v2 = vmax.f32 %v556_v0, 0.0  ;;  %v571_v4 = vadd.f32 %v1160_v1, %v1593_v51 }
 0x112   : > { %v565_v5 = vpop.f32.mrf.mxu0 }
 0x113   : > { %v566_v6 = vadd.f32 %v1593_v51, %v565_v5  ;;  %1235 = vmatprep.mubr.f32.mxu1 %v618_v2  ;;  %v621_v9 = vmax.f32 %v571_v4, 0.0 }
 0x114   : > { %v1163_v7 = vpop.f32.mrf.mxu0  ;;  %1236 = vmatmul.mubr.f32.gmra.mxu1 %v619_v3 }
 0x115   : > { %v620_v8 = vmax.f32 %v566_v6, 0.0  ;;  %v581_v10 = vadd.f32 %v1163_v7, %v1593_v51 }
 0x116   : > { %v575_v11 = vpop.f32.mrf.mxu0 }
 0x117   : > { %v576_v12 = vadd.f32 %v1593_v51, %v575_v11  ;;  %1238 = vmatprep.mubr.f32.mxu1 %v620_v8  ;;  %v623_v15 = vmax.f32 %v581_v10, 0.0 }
 0x118   : > { %v1166_v13 = vpop.f32.mrf.mxu0  ;;  %1239 = vmatmul.mubr.f32.gmra.mxu1 %v621_v9 }
 0x119   : > { %v622_v14 = vmax.f32 %v576_v12, 0.0  ;;  %v591_v16 = vadd.f32 %v1166_v13, %v1593_v51 }
 0x11a   : > { %v585_v17 = vpop.f32.mrf.mxu0 }
 0x11b   : > { %v586_v18 = vadd.f32 %v1593_v51, %v585_v17  ;;  %1241 = vmatprep.mubr.f32.mxu1 %v622_v14  ;;  %v625_v20 = vmax.f32 %v591_v16, 0.0 }
 0x11c   : > { %1242 = vmatmul.mubr.f32.gmra.mxu1 %v623_v15 }
 0x11d   : > { %v624_v19 = vmax.f32 %v586_v18, 0.0 }
 0x11f   : > { %1244 = vmatprep.mubr.f32.mxu1 %v624_v19 }
 0x120   : > { %1245 = vmatmul.mubr.f32.gmra.mxu1 %v625_v20 }
 0x1a3   : > { %v1201_v22 = vpop.f32.mrf.mxu0 }
 0x1a4   : > { %v721_v23 = vadd.f32 %v1201_v22, %v1633_v21 }
 0x1a5   : > { %v715_v24 = vpop.f32.mrf.mxu0 }
 0x1a6   : > { %875 = vst [vmem:[%s1636_s7 + $0x8] sm:$0xff] %v721_v23  ;;  %v716_v51 = vadd.f32 %v1633_v21, %v715_v24 }
 0x1a8   : > { %v1204_v25 = vpop.f32.mrf.mxu0  ;;  %874 = vst [vmem:[%s1636_s7] sm:$0xff] %v716_v51 }
 0x1a9   : > { %v731_v26 = vadd.f32 %v1204_v25, %v1633_v21 }
 0x1aa   : > { %v725_v27 = vpop.f32.mrf.mxu0 }
 0x1ab   : > { %877 = vst [vmem:[%s1636_s7 + $0x18] sm:$0xff] %v731_v26  ;;  %v726_v28 = vadd.f32 %v1633_v21, %v725_v27 }
 0x1ac   : > { %v1207_v29 = vpop.f32.mrf.mxu0 }
 0x1ad   : > { %876 = vst [vmem:[%s1636_s7 + $0x10] sm:$0xff] %v726_v28  ;;  %v741_v30 = vadd.f32 %v1207_v29, %v1633_v21 }
 0x1ae   : > { %v735_v31 = vpop.f32.mrf.mxu0 }
 0x1af   : > { %879 = vst [vmem:[%s1636_s7 + $0x28] sm:$0xff] %v741_v30  ;;  %v736_v32 = vadd.f32 %v1633_v21, %v735_v31 }
 0x1b0   : > { %v1210_v33 = vpop.f32.mrf.mxu1 }
 0x1b1   : > { %878 = vst [vmem:[%s1636_s7 + $0x20] sm:$0xff] %v736_v32  ;;  %v751_v34 = vadd.f32 %v1210_v33, %v1633_v21 }
 0x1b2   : > { %v745_v35 = vpop.f32.mrf.mxu1 }
 0x1b3   : > { %881 = vst [vmem:[%s1636_s7 + $0x38] sm:$0xff] %v751_v34  ;;  %v746_v36 = vadd.f32 %v1633_v21, %v745_v35 }
 0x1b4   : > { %v1213_v37 = vpop.f32.mrf.mxu1 }
 0x1b5   : > { %880 = vst [vmem:[%s1636_s7 + $0x30] sm:$0xff] %v746_v36  ;;  %v761_v38 = vadd.f32 %v1213_v37, %v1633_v21 }
 0x1b6   : > { %v755_v39 = vpop.f32.mrf.mxu1 }
 0x1b7   : > { %883 = vst [vmem:[%s1636_s7 + $0x48] sm:$0xff] %v761_v38  ;;  %v756_v40 = vadd.f32 %v1633_v21, %v755_v39 }
 0x1b8   : > { %v1216_v41 = vpop.f32.mrf.mxu1 }
 0x1b9   : > { %882 = vst [vmem:[%s1636_s7 + $0x40] sm:$0xff] %v756_v40  ;;  %v771_v42 = vadd.f32 %v1216_v41, %v1633_v21 }
 0x1ba   : > { %v765_v43 = vpop.f32.mrf.mxu1 }
 0x1bb   : > { %885 = vst [vmem:[%s1636_s7 + $0x58] sm:$0xff] %v771_v42  ;;  %v766_v44 = vadd.f32 %v1633_v21, %v765_v43 }
 0x1bc   : > { %v1219_v45 = vpop.f32.mrf.mxu1 }
 0x1bd   : > { %884 = vst [vmem:[%s1636_s7 + $0x50] sm:$0xff] %v766_v44  ;;  %v781_v46 = vadd.f32 %v1219_v45, %v1633_v21 }
 0x1be   : > { %v775_v47 = vpop.f32.mrf.mxu1 }
 0x1bf   : > { %887 = vst [vmem:[%s1636_s7 + $0x68] sm:$0xff] %v781_v46  ;;  %v776_v48 = vadd.f32 %v1633_v21, %v775_v47 }
 0x1c0   : > { %v1222_v49 = vpop.f32.mrf.mxu1 }
 0x1c1   : > { %886 = vst [vmem:[%s1636_s7 + $0x60] sm:$0xff] %v776_v48  ;;  %v791_v50 = vadd.f32 %v1222_v49, %v1633_v21 }
 0x1c2   : > { %v785_v52 = vpop.f32.mrf.mxu1 }
 0x1c3   : > { %889 = vst [vmem:[%s1636_s7 + $0x78] sm:$0xff] %v791_v50  ;;  %v786_v53 = vadd.f32 %v1633_v21, %v785_v52 }
 0x1c4   : > { %v1225_v54 = vpop.f32.mrf.mxu1 }
 0x1c5   : > { %888 = vst [vmem:[%s1636_s7 + $0x70] sm:$0xff] %v786_v53  ;;  %v801_v55 = vadd.f32 %v1225_v54, %v1633_v21 }
 0x1c6   : > { %v795_v56 = vpop.f32.mrf.mxu1 }
 0x1c7   : > { %891 = vst [vmem:[%s1636_s7 + $0x88] sm:$0xff] %v801_v55  ;;  %v796_v57 = vadd.f32 %v1633_v21, %v795_v56 }
 0x1c8   : > { %v1228_v58 = vpop.f32.mrf.mxu1 }
 0x1c9   : > { %890 = vst [vmem:[%s1636_s7 + $0x80] sm:$0xff] %v796_v57  ;;  %v811_v59 = vadd.f32 %v1228_v58, %v1633_v21 }
 0x1ca   : > { %v805_v60 = vpop.f32.mrf.mxu1 }
 0x1cb   : > { %893 = vst [vmem:[%s1636_s7 + $0x98] sm:$0xff] %v811_v59  ;;  %v806_v61 = vadd.f32 %v1633_v21, %v805_v60 }
 0x1cc   : > { %v1231_v62 = vpop.f32.mrf.mxu1 }
 0x1cd   : > { %892 = vst [vmem:[%s1636_s7 + $0x90] sm:$0xff] %v806_v61  ;;  %v821_v63 = vadd.f32 %v1231_v62, %v1633_v21 }
 0x1ce   : > { %v815_v0 = vpop.f32.mrf.mxu1 }
 0x1cf   : > { %895 = vst [vmem:[%s1636_s7 + $0xa8] sm:$0xff] %v821_v63  ;;  %v816_v1 = vadd.f32 %v1633_v21, %v815_v0 }
 0x1d0   : > { %v1234_v2 = vpop.f32.mrf.mxu1 }
 0x1d1   : > { %894 = vst [vmem:[%s1636_s7 + $0xa0] sm:$0xff] %v816_v1  ;;  %v831_v3 = vadd.f32 %v1234_v2, %v1633_v21 }
 0x1d2   : > { %v825_v4 = vpop.f32.mrf.mxu1 }
 0x1d3   : > { %897 = vst [vmem:[%s1636_s7 + $0xb8] sm:$0xff] %v831_v3  ;;  %v826_v5 = vadd.f32 %v1633_v21, %v825_v4 }
 0x1d4   : > { %v1237_v6 = vpop.f32.mrf.mxu1 }
 0x1d5   : > { %896 = vst [vmem:[%s1636_s7 + $0xb0] sm:$0xff] %v826_v5  ;;  %v841_v7 = vadd.f32 %v1237_v6, %v1633_v21 }
 0x1d6   : > { %v835_v8 = vpop.f32.mrf.mxu1 }
 0x1d7   : > { %899 = vst [vmem:[%s1636_s7 + $0xc8] sm:$0xff] %v841_v7  ;;  %v836_v9 = vadd.f32 %v1633_v21, %v835_v8 }
 0x1d8   : > { %v1240_v10 = vpop.f32.mrf.mxu1 }
 0x1d9   : > { %898 = vst [vmem:[%s1636_s7 + $0xc0] sm:$0xff] %v836_v9  ;;  %v851_v11 = vadd.f32 %v1240_v10, %v1633_v21 }
 0x1da   : > { %v845_v12 = vpop.f32.mrf.mxu1 }
 0x1db   : > { %901 = vst [vmem:[%s1636_s7 + $0xd8] sm:$0xff] %v851_v11  ;;  %v846_v13 = vadd.f32 %v1633_v21, %v845_v12 }
 0x1dc   : > { %v1243_v14 = vpop.f32.mrf.mxu1 }
 0x1dd   : > { %900 = vst [vmem:[%s1636_s7 + $0xd0] sm:$0xff] %v846_v13  ;;  %v861_v15 = vadd.f32 %v1243_v14, %v1633_v21 }
 0x1de   : > { %v855_v16 = vpop.f32.mrf.mxu1 }
 0x1df   : > { %903 = vst [vmem:[%s1636_s7 + $0xe8] sm:$0xff] %v861_v15  ;;  %v856_v17 = vadd.f32 %v1633_v21, %v855_v16 }
 0x1e0   : > { %v1246_v18 = vpop.f32.mrf.mxu1 }
 0x1e1   : > { %902 = vst [vmem:[%s1636_s7 + $0xe0] sm:$0xff] %v856_v17  ;;  %v871_v19 = vadd.f32 %v1246_v18, %v1633_v21 }
 0x1e2   : > { %v865_v20 = vpop.f32.mrf.mxu1 }
 0x1e3   : > { %905 = vst [vmem:[%s1636_s7 + $0xf8] sm:$0xff] %v871_v19  ;;  %v866_v22 = vadd.f32 %v1633_v21, %v865_v20 }
 0x1e5   : > { %904 = vst [vmem:[%s1636_s7 + $0xf0] sm:$0xff] %v866_v22 }
 0x1e6   : > { %1333 = shalt.err (!%p1330_p3)
}
 0x1e7   : > { %s1334_s16 = scalar_lea.hbm %s1703_s12, 4096  ;;  %s1338_s25 = scalar_lea.hbm %s1757_s5, 16384 }
 0x1e8   : > { %p1335_p4 = scmp.ne.s32.totalorder %s1703_s12, %s1334_s16  ;;  %p1339_p9 = scmp.lt.s32.totalorder %s1703_s12, %s1757_s5 }
 0x1e9   : > { %p1340_p10 = scmp.lt.s32.totalorder %s1338_s25, %s1334_s16 }
 0x1ea   : > { %p1336_p7 = pnand %p1335_p4, %p1453_p5 }
 0x1eb   : > { %p1341_p11 = por %p1340_p10, %p1339_p9 }
 0x1ec   : > { %p1337_p8 = pneg %p1336_p7 }
 0x1ee   : > { %p1342_p12 = pnand %p1341_p11, %p1337_p8 }
 0x1f0   : > { %1345 = shalt.err (!%p1342_p12)
}
 0x1f1   : > { %s1383_s7 = smov 128   ;;  %s1384_s8 = smov 8  }
 0x1f2   : > { %1279 = dma.vmem_to_hbm [thread:$0]  (%p1453_p5), %s1705_s9, 4096, %s1703_s12, %s1712_s22, %s1383_s7, %s1383_s7, %s1384_s8  }
 0x1f3 PF: > { %p1285_p13 = scmp.ge.s32.totalorder %s1380_s21, 2  ;;  %s935_s10 = sand.u32 1, %s1368_s18  }
 0x1f4   : > { %s936_s11 = scalar_lea.sflag [#allocation3], %s935_s10 }
 0x1f5   : > { %p1282_p0 = pnand %p1285_p13, %p1457_p6 }
 0x1f7   : > { %p1283_p1 = pneg %p1282_p0 }
 0x1f9   : > { %1363 = dma.done.wait (%p1283_p1), %s936_s11, 4096  }
 0x1fa   : > { %1365 = vsyncadd (%p1283_p1), %s936_s11, 4294963200  ;;  %p15_p2 = scmp.ge.s32.totalorder %s1440_s24, 6   ;;  %s1760_s18 = smov %s1372_s19 }
 0x1fb   : > { %s1761_s19 = smov %s1376_s20  ;;  %s1762_s20 = smov %s1451_s27 }
 0x1fc   : > { %s1763_s21 = smov %s1440_s24  ;;  %17 = sbr.rel (!%p15_p2) target bundleno = 3 (0x3), region = 75 }
 0x201   :  { %941 = vsyncpa [#allocation3], 1 }
 0x202   :  { %943 = vsyncpa [#allocation3 + $0x1], 1 }

</bundles_post_ra>
